<compile_context>
chip_gen: v7x
topology: tpu7x:2x2x1
jax: 0.10.0
libtpu: 0.0.40
codegen_flags: <defaults>
</compile_context>

<pallas_src>
import jax
import jax.numpy as jnp
from jax.experimental import pallas as pl
from jax.experimental.pallas import tpu as pltpu


_LANE = 128
_SUBLANE = 8
# Budget for the double-buffered input blocks (2x pipeline buffers per input).
_VMEM_BLOCK_BUDGET = 40 * 1024 * 1024
# Explicit scoped-VMEM limit: below v7x's 64 MiB physical, comfortably within
# v5e/v6e's 128 MiB.
_VMEM_LIMIT_BYTES = 56 * 1024 * 1024


def _at_pair_kernel(s_ref, t_ref, out_ref):
    """One batch-block of the attention-transfer squared-difference sum.

    s_ref   : (BN, C_s, HW) VMEM tile (student)
    t_ref   : (BN, C_t, HW) VMEM tile (teacher)
    out_ref : (1, 8, 128)   VMEM tile -- block partial sum splatted (lane-dense
                                          unmasked store); wrapper reads [0, 0].
    """
    s = s_ref[...].astype(jnp.float32)          # (BN, C_s, HW)
    t = t_ref[...].astype(jnp.float32)          # (BN, C_t, HW)

    # Channel reduction. Use sum() instead of mean(): the constant 1/C factor
    # cancels in the per-row L2 normalization below.
    s_att = jnp.sum(s * s, axis=1)              # (BN, HW)
    t_att = jnp.sum(t * t, axis=1)              # (BN, HW)

    # torch.nn.functional.normalize semantics:  a / max(||a||, eps)
    # rewritten as  a * rsqrt(max(||a||^2, eps^2))  so the normalization runs
    # on the EUP (rsqrt) + one VPU multiply instead of sqrt + divide.
    eps2 = jnp.float32(1e-24)                   # (1e-12)**2
    s_inv = jax.lax.rsqrt(
        jnp.maximum(jnp.sum(s_att * s_att, axis=-1, keepdims=True), eps2))
    t_inv = jax.lax.rsqrt(
        jnp.maximum(jnp.sum(t_att * t_att, axis=-1, keepdims=True), eps2))

    diff = s_att * s_inv - t_att * t_inv
    partial = jnp.sum(diff * diff)              # scalar: sum over (BN, HW)

    out_ref[...] = jnp.full(out_ref.shape, partial, dtype=out_ref.dtype)


def _largest_divisor_le(n, cap):
    cap = max(1, min(n, cap))
    for d in range(cap, 0, -1):
        if n % d == 0:
            return d
    return 1


def _at_pair_sum_sq(student_fm, teacher_fm):
    """Raw sum over the (N, HW) map of (at_s - at_t)**2 for one NCHW pair.

    Returns (sum_sq, n * hw) so the caller can fold the mean + *100 scaling.
    """
    n, c_s, h, w = student_fm.shape
    n_t, c_t, h_t, w_t = teacher_fm.shape
    assert n == n_t and h == h_t and w == w_t, "batch/spatial dims must match"
    hw = h * w

    # (N, C, HW): spatial axis on lanes, channel reduction along sublanes.
    s = student_fm.reshape(n, c_s, hw)
    t = teacher_fm.reshape(n, c_t, hw)

    # Largest batch block whose double-buffered inputs fit the VMEM budget.
    bytes_per_elem = (c_s * s.dtype.itemsize + c_t * t.dtype.itemsize) * hw
    bn_cap = max(1, _VMEM_BLOCK_BUDGET // (2 * bytes_per_elem))
    bn = _largest_divisor_le(n, bn_cap)
    num_blocks = n // bn

    partials = pl.pallas_call(
        _at_pair_kernel,
        out_shape=jax.ShapeDtypeStruct((num_blocks, _SUBLANE, _LANE), jnp.float32),
        grid_spec=pltpu.PrefetchScalarGridSpec(
            num_scalar_prefetch=0,
            grid=(num_blocks,),
            in_specs=[
                pl.BlockSpec((bn, c_s, hw), lambda i: (i, 0, 0)),
                pl.BlockSpec((bn, c_t, hw), lambda i: (i, 0, 0)),
            ],
            # Per-block partial output -> no cross-iteration accumulator, so
            # the batch grid axis can be split across TensorCores.
            out_specs=pl.BlockSpec((1, _SUBLANE, _LANE), lambda i: (i, 0, 0)),
        ),
        compiler_params=pltpu.CompilerParams(
            dimension_semantics=("parallel",),
            vmem_limit_bytes=_VMEM_LIMIT_BYTES,
        ),
    )(s, t)

    return jnp.sum(partials[:, 0, 0]), n * hw


def at_loss(student_features, teacher_features):
    """ATLoss.forward, mode='code': sum of per-pair mean-squared AT diffs * 100."""
    # TODO(synk): pairs with identical (N, HW) could share a single pallas_call
    # (extra grid axis over pairs); kept per-pair launches to support mixed shapes.
    total = jnp.float32(0.0)
    factor = 1.0
    for s_fm, t_fm in zip(student_features, teacher_features):
        sum_sq, denom = _at_pair_sum_sq(s_fm, t_fm)
        total = total + factor * (sum_sq / jnp.float32(denom))
    return total * 100.0


def _at_loss_ref(student_features, teacher_features):
    """Pure-JAX reference of the same math, for a sanity check."""
    def att(fm):
        n = fm.shape[0]
        a = jnp.mean(fm.astype(jnp.float32) ** 2, axis=1).reshape(n, -1)
        nrm = jnp.sqrt(jnp.sum(a * a, axis=1, keepdims=True))
        return a / jnp.maximum(nrm, 1e-12)

    total = 0.0
    for s_fm, t_fm in zip(student_features, teacher_features):
        d = att(s_fm) - att(t_fm)
        total = total + jnp.mean(d * d)
    return total * 100.0


if __name__ == "__main__":
    key = jax.random.PRNGKey(0)
    k1, k2, k3, k4 = jax.random.split(key, 4)

    # Two feature-map pairs (student / teacher may differ in channel count,
    # but share batch and spatial dims), NCHW.
    student_features = [
        jax.random.normal(k1, (2, 4, 16, 16), dtype=jnp.float32),
        jax.random.normal(k2, (2, 8, 8, 8), dtype=jnp.float32),
    ]
    teacher_features = [
        jax.random.normal(k3, (2, 8, 16, 16), dtype=jnp.float32),
        jax.random.normal(k4, (2, 16, 8, 8), dtype=jnp.float32),
    ]

    loss = at_loss(student_features, teacher_features)
    loss = jax.block_until_ready(loss)

    ref = _at_loss_ref(student_features, teacher_features)
    assert jnp.allclose(loss, ref, rtol=1e-5, atol=1e-5), (loss, ref)

    print("KERNEL_OK")
</pallas_src>

<mosaic_0001>
module attributes {stable_mosaic.version = 11 : i64} {
  func.func @_at_pair_kernel(%arg0: i32, %arg1: memref<2x4x256xf32, #tpu.memory_space<vmem>>, %arg2: memref<2x8x256xf32, #tpu.memory_space<vmem>>, %arg3: memref<1x8x128xf32, #tpu.memory_space<vmem>>) attributes {dimension_semantics = [#tpu.dimension_semantics<parallel>], iteration_bounds = array<i64: 1>, scalar_prefetch = 0 : i64, scratch_operands = 0 : i64, tpu.core_type = #tpu.core_type<tc>, window_params = [{transform_indices = @transform_0, window_bounds = array<i64: 2, 4, 256>}, {transform_indices = @transform_1, window_bounds = array<i64: 2, 8, 256>}, {transform_indices = @transform_2, window_bounds = array<i64: 1, 8, 128>}]} {
    %c0 = arith.constant 0 : index
    %c0_0 = arith.constant 0 : index
    %c0_1 = arith.constant 0 : index
    %0 = vector.load %arg1[%c0, %c0_0, %c0_1] : memref<2x4x256xf32, #tpu.memory_space<vmem>>, vector<2x4x256xf32>
    %c0_2 = arith.constant 0 : index
    %c0_3 = arith.constant 0 : index
    %c0_4 = arith.constant 0 : index
    %1 = vector.load %arg2[%c0_2, %c0_3, %c0_4] : memref<2x8x256xf32, #tpu.memory_space<vmem>>, vector<2x8x256xf32>
    %2 = arith.mulf %0, %0 : vector<2x4x256xf32>
    %cst = arith.constant dense<0.000000e+00> : vector<2x256xf32>
    %3 = vector.multi_reduction <add>, %2, %cst [1] : vector<2x4x256xf32> to vector<2x256xf32>
    %4 = arith.mulf %1, %1 : vector<2x8x256xf32>
    %cst_5 = arith.constant dense<0.000000e+00> : vector<2x256xf32>
    %5 = vector.multi_reduction <add>, %4, %cst_5 [1] : vector<2x8x256xf32> to vector<2x256xf32>
    %6 = arith.mulf %3, %3 : vector<2x256xf32>
    %cst_6 = arith.constant dense<0.000000e+00> : vector<2xf32>
    %7 = vector.multi_reduction <add>, %6, %cst_6 [1] : vector<2x256xf32> to vector<2xf32>
    %8 = vector.shape_cast %7 : vector<2xf32> to vector<2x1xf32>
    %cst_7 = arith.constant 1.000000e-24 : f32
    %9 = vector.broadcast %cst_7 : f32 to vector<2x1xf32>
    %10 = arith.maximumf %8, %9 : vector<2x1xf32>
    %11 = math.rsqrt %10 : vector<2x1xf32>
    %12 = arith.mulf %5, %5 : vector<2x256xf32>
    %cst_8 = arith.constant dense<0.000000e+00> : vector<2xf32>
    %13 = vector.multi_reduction <add>, %12, %cst_8 [1] : vector<2x256xf32> to vector<2xf32>
    %14 = vector.shape_cast %13 : vector<2xf32> to vector<2x1xf32>
    %cst_9 = arith.constant 1.000000e-24 : f32
    %15 = vector.broadcast %cst_9 : f32 to vector<2x1xf32>
    %16 = arith.maximumf %14, %15 : vector<2x1xf32>
    %17 = math.rsqrt %16 : vector<2x1xf32>
    %18 = vector.broadcast %11 : vector<2x1xf32> to vector<2x256xf32>
    %19 = arith.mulf %3, %18 : vector<2x256xf32>
    %20 = vector.broadcast %17 : vector<2x1xf32> to vector<2x256xf32>
    %21 = arith.mulf %5, %20 : vector<2x256xf32>
    %22 = arith.subf %19, %21 : vector<2x256xf32>
    %23 = arith.mulf %22, %22 : vector<2x256xf32>
    %24 = vector.shape_cast %23 : vector<2x256xf32> to vector<1x2x256xf32>
    %cst_10 = arith.constant dense<0.000000e+00> : vector<1xf32>
    %25 = vector.multi_reduction <add>, %24, %cst_10 [1, 2] : vector<1x2x256xf32> to vector<1xf32>
    %26 = vector.shape_cast %25 : vector<1xf32> to vector<1x1x1xf32>
    %27 = vector.extract %26[0, 0, 0] : f32 from vector<1x1x1xf32>
    %28 = vector.broadcast %27 : f32 to vector<1x8x128xf32>
    %c0_11 = arith.constant 0 : index
    %c0_12 = arith.constant 0 : index
    %c0_13 = arith.constant 0 : index
    %29 = vector.load %arg3[%c0_11, %c0_12, %c0_13] : memref<1x8x128xf32, #tpu.memory_space<vmem>>, vector<1x8x128xf32>
    tpu.vector_store %arg3[%c0_11, %c0_12, %c0_13], %28 {strides = array<i32>} : memref<1x8x128xf32, #tpu.memory_space<vmem>>, vector<1x8x128xf32>,
    return
  }
  func.func @transform_0(%arg0: i32) -> (i32, i32, i32) {
    %c0_i32 = arith.constant 0 : i32
    %c0_i32_0 = arith.constant 0 : i32
    %c0_i32_1 = arith.constant 0 : i32
    return %arg0, %c0_i32, %c0_i32_0 : i32, i32, i32
  }
  func.func @transform_1(%arg0: i32) -> (i32, i32, i32) {
    %c0_i32 = arith.constant 0 : i32
    %c0_i32_0 = arith.constant 0 : i32
    %c0_i32_1 = arith.constant 0 : i32
    return %arg0, %c0_i32, %c0_i32_0 : i32, i32, i32
  }
  func.func @transform_2(%arg0: i32) -> (i32, i32, i32) {
    %c0_i32 = arith.constant 0 : i32
    %c0_i32_0 = arith.constant 0 : i32
    %c0_i32_1 = arith.constant 0 : i32
    return %arg0, %c0_i32, %c0_i32_0 : i32, i32, i32
  }
}

</mosaic_0001>

<bundles_post_ra>
// kernel: tpu_custom_call.1
= control target key start
LH: loop header
LB: loop body
LE: loop exit
PB: predicated region body
PF: predicated region fallthrough
CT: control target
= control target key end

     0   :  { %7 = vsyncpa [#allocation3], 0  ;;  %s374_s0 = inlined_call_operand.hbm [shape: f32[2,4,256], index: 0, kind: input, shape index: {}]   ;;  %s375_s1 = inlined_call_operand.hbm [shape: f32[2,8,256], index: 1, kind: input, shape index: {}]   ;;  %s376_s2 = inlined_call_operand.hbm [shape: f32[1,8,128], index: 2, kind: output, shape index: {}]  }
   0x1   :  { %8 = vsyncpa [#allocation6], 0 }
   0x2   :  { %9 = vsyncpa [#allocation4], 0  ;;  %s300_s9 = smov [#allocation2]   ;;  %s228_s13 = scalar_lea.hbm %s374_s0, 256 }
   0x3   :  { %s15_s10 = sshll.u32 %s300_s9, 4  ;;  %p229_p0 = scmp.ne.s32.totalorder %s374_s0, %s228_s13  ;;  %s16_s10 = int_to_ptr.vmem [resolvable:$true] %s15_s10 }
   0x4   :  { %p232_p1 = scmp.lt.u32.totalorder %s228_s13, %s374_s0 }
   0x6   :  { %p234_p2 = pnand %p232_p1, %p229_p0 }
   0x8   :  { %237 = shalt.err (!%p234_p2)
}
   0x9   :  { %s238_s18 = scalar_lea.vmem %s16_s10, 256  ;;  %p243_p4 = scmp.lt.s32.totalorder %s16_s10, %s16_s10 }
   0xa   :  { %p239_p3 = scmp.ne.s32.totalorder %s16_s10, %s238_s18  ;;  %p244_p5 = scmp.lt.s32.totalorder %s238_s18, %s238_s18 }
   0xc   :  { %p245_p6 = por %p244_p5, %p243_p4 }
   0xe   :  { %p246_p7 = pnand %p245_p6, %p239_p3 }
  0x10   :  { %249 = shalt.err (!%p246_p7)
}
  0x11   :  { %s301_s19 = smov 128   ;;  %s302_s20 = smov 8  }
  0x12   :  { %21 = dma.hbm_to_vmem [thread:$0]  %s374_s0, 256, %s16_s10, [#allocation3], %s301_s19, %s301_s19, %s302_s20  }
  0x13   :  { %s303_s23 = smov [#allocation5]   ;;  %s250_s27 = scalar_lea.hbm %s375_s1, 512 }
  0x14   :  { %s27_s24 = sshll.u32 %s303_s23, 4  ;;  %p251_p8 = scmp.ne.s32.totalorder %s375_s1, %s250_s27  ;;  %s28_s24 = int_to_ptr.vmem [resolvable:$true] %s27_s24 }
  0x15   :  { %p254_p9 = scmp.lt.u32.totalorder %s250_s27, %s375_s1 }
  0x17   :  { %p256_p10 = pnand %p254_p9, %p251_p8 }
  0x19   :  { %259 = shalt.err (!%p256_p10)
}
  0x1a   :  { %s260_s4 = scalar_lea.vmem %s28_s24, 512  ;;  %p265_p12 = scmp.lt.s32.totalorder %s28_s24, %s28_s24 }
  0x1b   :  { %p261_p11 = scmp.ne.s32.totalorder %s28_s24, %s260_s4  ;;  %p266_p13 = scmp.lt.s32.totalorder %s260_s4, %s260_s4 }
  0x1d   :  { %p267_p0 = por %p266_p13, %p265_p12 }
  0x1f   :  { %p268_p1 = pnand %p267_p0, %p261_p11 }
  0x21   :  { %271 = shalt.err (!%p268_p1)
}
  0x22   :  { %s304_s0 = smov 256   ;;  %s305_s5 = smov 16  }
  0x23   :  { %33 = dma.hbm_to_vmem [thread:$0]  %s375_s1, 512, %s28_s24, [#allocation6], %s304_s0, %s304_s0, %s305_s5  }
  0x24   :  { %294 = dma.done.wait [#allocation3], 256  }
  0x25   :  { %295 = vsyncadd [#allocation3], 4294967040 }
  0x26   :  { %296 = dma.done.wait [#allocation6], 512  }
  0x27   :  { %297 = vsyncadd [#allocation6], 4294966784  ;;  %v40_v0 = vld [vmem:[#allocation2] sm:$0xff]  ;;  %v41_v1 = vld [vmem:[#allocation2 + $0x8] sm:$0xff]  ;;  %vm54_vm0 = vcmask 1043456   ;;  %vm119_vm1 = vcmask 1041409  }
  0x28   :  { %v42_v2 = vld [vmem:[#allocation5] sm:$0xff]  ;;  %v46_v3 = vmul.f32 %v40_v0, %v40_v0  ;;  %v47_v4 = vmul.f32 %v41_v1, %v41_v1  ;;  %v43_v5 = vld [vmem:[#allocation5 + $0x8] sm:$0xff]  ;;  %v44_v6 = vld [vmem:[#allocation5 + $0x10] sm:$0xff]  ;;  %vm124_vm2 = vcmask 1041408   ;;  %s306_s1 = smov [#allocation7]  }
  0x29   :  { %v45_v7 = vld [vmem:[#allocation5 + $0x18] sm:$0xff]  ;;  %v83_v8 = vmul.f32 %v42_v2, %v42_v2  ;;  %v84_v9 = vmul.f32 %v43_v5, %v43_v5  ;;  %v85_v10 = vmul.f32 %v44_v6, %v44_v6  ;;  %s205_s8 = sshll.u32 %s306_s1, 4  ;;  %s206_s8 = int_to_ptr.vmem [resolvable:$true] %s205_s8 }
  0x2a   :  { %v86_v11 = vmul.f32 %v45_v7, %v45_v7  ;;  %v50_v12 = vcombine.high %v46_v3, %v46_v3  ;;  %v51_v13 = vcombine.high %v47_v4, %v47_v4  ;;  %v55_v14 = vsel %vm54_vm0, %v46_v3, 0.0  ;;  %s272_s10 = scalar_lea.vmem %s206_s8, 128  ;;  %p277_p3 = scmp.lt.s32.totalorder %s206_s8, %s206_s8 }
  0x2b   :  { %v69_v15 = vsel %vm54_vm0, %v47_v4, 0.0  ;;  %v56_v16 = vrot.slane %v55_v14, 4  ;;  %v87_v18 = vrot.slane %v83_v8, 4  ;;  %v93_v19 = vrot.slane %v84_v9, 4  ;;  %p273_p2 = scmp.ne.s32.totalorder %s206_s8, %s272_s10  ;;  %p278_p4 = scmp.lt.s32.totalorder %s272_s10, %s272_s10 }
  0x2c   :  { %v70_v17 = vrot.slane %v69_v15, 4  ;;  %v62_v20 = vsel %vm54_vm0, %v50_v12, 0.0  ;;  %v76_v21 = vsel %vm54_vm0, %v51_v13, 0.0  ;;  %v99_v22 = vrot.slane %v85_v10, 4 }
  0x2d   :  { %v105_v23 = vrot.slane %v86_v11, 4  ;;  %v57_v24 = vadd.f32 %v56_v16, %v55_v14  ;;  %v63_v25 = vrot.slane %v62_v20, 4  ;;  %v77_v27 = vrot.slane %v76_v21, 4  ;;  %p279_p5 = por %p278_p4, %p277_p3 }
  0x2e   :  { %v71_v26 = vadd.f32 %v70_v17, %v69_v15  ;;  %v88_v28 = vadd.f32 %v87_v18, %v83_v8  ;;  %v94_v29 = vadd.f32 %v93_v19, %v84_v9  ;;  %v100_v30 = vadd.f32 %v99_v22, %v85_v10 }
  0x2f   :  { %v106_v31 = vadd.f32 %v105_v23, %v86_v11  ;;  %v58_v32 = vrot.slane %v57_v24, 2  ;;  %v64_v33 = vadd.f32 %v63_v25, %v62_v20  ;;  %v78_v35 = vadd.f32 %v77_v27, %v76_v21  ;;  %p280_p6 = pnand %p279_p5, %p273_p2 }
  0x30   :  { %v72_v34 = vrot.slane %v71_v26, 2  ;;  %v89_v36 = vrot.slane %v88_v28, 2  ;;  %v95_v37 = vrot.slane %v94_v29, 2  ;;  %v101_v38 = vrot.slane %v100_v30, 2 }
  0x31   :  { %v107_v39 = vrot.slane %v106_v31, 2  ;;  %v59_v40 = vadd.f32 %v58_v32, %v57_v24  ;;  %v65_v41 = vrot.slane %v64_v33, 2  ;;  %v79_v43 = vrot.slane %v78_v35, 2 }
  0x32   :  { %v73_v42 = vadd.f32 %v72_v34, %v71_v26  ;;  %v90_v44 = vadd.f32 %v89_v36, %v88_v28  ;;  %v96_v45 = vadd.f32 %v95_v37, %v94_v29  ;;  %v102_v46 = vadd.f32 %v101_v38, %v100_v30 }
  0x33   :  { %v108_v47 = vadd.f32 %v107_v39, %v106_v31  ;;  %v60_v48 = vrot.slane %v59_v40, 1  ;;  %v66_v49 = vadd.f32 %v65_v41, %v64_v33  ;;  %v80_v51 = vadd.f32 %v79_v43, %v78_v35 }
  0x34   :  { %v74_v50 = vrot.slane %v73_v42, 1  ;;  %v91_v52 = vrot.slane %v90_v44, 1  ;;  %v97_v53 = vrot.slane %v96_v45, 1  ;;  %v103_v54 = vrot.slane %v102_v46, 1 }
  0x35   :  { %v109_v55 = vrot.slane %v108_v47, 1  ;;  %v61_v56 = vadd.f32 %v60_v48, %v59_v40  ;;  %v67_v57 = vrot.slane %v66_v49, 1  ;;  %v81_v59 = vrot.slane %v80_v51, 1 }
  0x36   :  { %v75_v58 = vadd.f32 %v74_v50, %v73_v42  ;;  %v92_v60 = vadd.f32 %v91_v52, %v90_v44  ;;  %v98_v61 = vadd.f32 %v97_v53, %v96_v45  ;;  %v104_v62 = vadd.f32 %v103_v54, %v102_v46 }
  0x37   :  { %v110_v63 = vadd.f32 %v109_v55, %v108_v47  ;;  %v68_v0 = vadd.f32 %v67_v57, %v66_v49  ;;  %v82_v1 = vadd.f32 %v81_v59, %v80_v51  ;;  %v111_v2 = vmul.f32 %v61_v56, %v61_v56 }
  0x38   :  { %v113_v3 = vmul.f32 %v75_v58, %v75_v58  ;;  %v132_v4 = vmul.f32 %v92_v60, %v92_v60  ;;  %v133_v5 = vmul.f32 %v98_v61, %v98_v61  ;;  %v134_v6 = vmul.f32 %v104_v62, %v104_v62 }
  0x39   :  { %v135_v7 = vmul.f32 %v110_v63, %v110_v63  ;;  %v112_v8 = vmul.f32 %v68_v0, %v68_v0  ;;  %v114_v9 = vmul.f32 %v82_v1, %v82_v1 }
  0x3a   :  { %v120_v10 = vsel %vm119_vm1, %v113_v3, %v111_v2  ;;  %v140_v12 = vsel %vm119_vm1, %v134_v6, %v132_v4 }
  0x3b   :  { %v125_v11 = vsel %vm124_vm2, %v120_v10, 0.0  ;;  %v141_v13 = vsel %vm119_vm1, %v135_v7, %v133_v5  ;;  %v121_v14 = vsel %vm119_vm1, %v114_v9, %v112_v8  ;;  %v144_v16 = vsel %vm124_vm2, %v140_v12, 0.0 }
  0x3c   :  { %v126_v15 = vsel %vm124_vm2, %v121_v14, 0.0  ;;  %v145_v17 = vsel %vm124_vm2, %v141_v13, 0.0 }
  0x3d   :  { %v127_v18 = vadd.f32 %v126_v15, %v125_v11  ;;  %v146_v19 = vadd.f32 %v145_v17, %v144_v16 }
  0x3f   :  { %128 = vadd.xlane.f32.xlu0 %v127_v18 }
  0x43   :  { %147 = vadd.xlane.f32.xlu0 %v146_v19 }
  0xcc   :  { %v129_v20 = vpop.xlane.xlu0 %128 }
  0xcd   :  { %v130_v21 = vmax.f32 %v129_v20, 1e-24 }
  0xcf   :  { %224 = vrsqrt.f32 %v130_v21 }
  0xd0   :  { %v148_v22 = vpop.xlane.xlu0 %147 }
  0xd1   :  { %v149_v23 = vmax.f32 %v148_v22, 1e-24 }
  0xd3   :  { %226 = vrsqrt.f32 %v149_v23 }
  0xd9   :  { %v225_v24 = vpop.eup %224 }
  0xda   :  { %v152_v25 = vrot.slane %v225_v24, 1  ;;  %v155_v30 = vmul.f32 %v225_v24, %v61_v56  ;;  %v156_v31 = vmul.f32 %v225_v24, %v68_v0 }
  0xdc   :  { %v157_v32 = vmul.f32 %v152_v25, %v75_v58  ;;  %v158_v33 = vmul.f32 %v152_v25, %v82_v1 }
  0xdd   :  { %v227_v26 = vpop.eup %226 }
  0xde   :  { %v160_v27 = vrot.slane %v227_v26, 1  ;;  %v163_v28 = vmul.f32 %v227_v26, %v92_v60  ;;  %v164_v29 = vmul.f32 %v227_v26, %v98_v61 }
  0xe0   :  { %v165_v34 = vmul.f32 %v160_v27, %v104_v62  ;;  %v166_v35 = vmul.f32 %v160_v27, %v110_v63  ;;  %v167_v36 = vsub.f32 %v155_v30, %v163_v28  ;;  %v168_v37 = vsub.f32 %v156_v31, %v164_v29 }
  0xe2   :  { %v169_v38 = vsub.f32 %v157_v32, %v165_v34  ;;  %v170_v39 = vsub.f32 %v158_v33, %v166_v35  ;;  %v171_v42 = vmul.f32 %v167_v36, %v167_v36  ;;  %v172_v43 = vmul.f32 %v168_v37, %v168_v37 }
  0xe4   :  { %v173_v40 = vmul.f32 %v169_v38, %v169_v38  ;;  %v174_v41 = vmul.f32 %v170_v39, %v170_v39 }
  0xe6   :  { %v179_v44 = vrot.slane %v173_v40, 7  ;;  %v181_v45 = vrot.slane %v174_v41, 7 }
  0xe8   :  { %v180_v46 = vsel %vm119_vm1, %v179_v44, %v171_v42  ;;  %v182_v47 = vsel %vm119_vm1, %v181_v45, %v172_v43 }
  0xe9   :  { %v185_v48 = vsel %vm124_vm2, %v180_v46, 0.0  ;;  %v186_v49 = vsel %vm124_vm2, %v182_v47, 0.0 }
  0xea   :  { %v187_v50 = vadd.f32 %v186_v49, %v185_v48 }
  0xec   :  { %188 = vadd.xlane.f32.xlu1 %v187_v50 }
 0x179   :  { %v189_v51 = vpop.xlane.xlu1 %188 }
 0x17a   :  { %v190_v52 = vrot.slane %v189_v51, 4 }
 0x17c   :  { %v191_v53 = vadd.f32 %v190_v52, %v189_v51 }
 0x17e   :  { %v192_v54 = vrot.slane %v191_v53, 2 }
 0x180   :  { %v193_v55 = vadd.f32 %v192_v54, %v191_v53 }
 0x182   :  { %v194_v56 = vrot.slane %v193_v55, 1 }
 0x184   :  { %v195_v57 = vadd.f32 %v194_v56, %v193_v55 }
 0x186   :  { %215 = vpush %v195_v57 }
 0x1b7   :  { %s216_s9 = spop %215 }
 0x1b8   :  { %v197_v58 = vstv %s216_s9 }
 0x1b9   :  { %198 = vst [vmem:[#allocation7] sm:$0xff] %v197_v58 }
 0x1ba   :  { %283 = shalt.err (!%p280_p6)
}
 0x1bb   :  { %s284_s13 = scalar_lea.hbm %s376_s2, 128 }
 0x1bc   :  { %p285_p7 = scmp.ne.s32.totalorder %s376_s2, %s284_s13  ;;  %p288_p8 = scmp.lt.u32.totalorder %s284_s13, %s376_s2 }
 0x1be   :  { %p290_p9 = pnand %p288_p8, %p285_p7 }
 0x1c0   :  { %293 = shalt.err (!%p290_p9)
}
 0x1c1   :  { %208 = dma.vmem_to_hbm [thread:$0]  %s206_s8, 128, %s376_s2, [#allocation4]  }
 0x1c2   :  { %298 = dma.done.wait [#allocation4], 128  }
 0x1c3   :  { %299 = vsyncadd [#allocation4], 4294967168 }
 0x1c4   :  { %212 = vsyncpa [#allocation3], 1 }
 0x1c5   :  { %213 = vsyncpa [#allocation6], 1 }
 0x1c6   :  { %214 = vsyncpa [#allocation4], 1 }

</bundles_post_ra>
